<compile_context>
chip_gen: v6e
topology: v6e:2x2x1
jax: 0.10.0
libtpu: 0.0.40
codegen_flags: <defaults>
</compile_context>

<pallas_src>
import functools

import jax
import jax.numpy as jnp
from jax.experimental import pallas as pl
from jax.experimental.pallas import tpu as pltpu


def _round_up(x, m):
    return ((x + m - 1) // m) * m


# Per-grid-step score-tile byte budget (double-buffered input set ~= 2.5x this).
_TARGET_SCORE_TILE_BYTES = 2 * 1024 * 1024


def _dice_partial_kernel(score_ref, label_ref, acc_ref, *,
                         n_classes, apply_softmax, hw, tr, chunks_per_p,
                         need_mask):
    """One (batch n, split p, row-chunk c) grid step.

    score_ref : (C, tr, 128)  scores, native dtype (cast to f32 here)
    label_ref : (tr, 128)     class labels, native dtype
    acc_ref   : (3, C, 128)   f32 accumulators resident across the chunk axis:
                [0]=sum(score*onehot), [1]=sum(onehot), [2]=sum(score^2),
                reduced over rows only (lane axis reduced in the epilogue).
    """
    p = pl.program_id(1)
    c = pl.program_id(2)

    @pl.when(c == 0)
    def _():
        acc_ref[...] = jnp.zeros_like(acc_ref)

    x = score_ref[...].astype(jnp.float32)             # (C, tr, 128)
    labels = label_ref[...]                            # (tr, 128)

    if apply_softmax:
        # Class axis is leading -> per-vreg elementwise VPU max/sum.
        m = jnp.max(x, axis=0, keepdims=True)
        e = jnp.exp(x - m)
        x = e / jnp.sum(e, axis=0, keepdims=True)

    # One-hot predicate for all classes at once; compare in the label's own
    # numeric family (no wrapper-side HBM cast pass needed).
    cls = jax.lax.broadcasted_iota(jnp.int32, (n_classes, tr, 128), 0)
    if jnp.issubdtype(label_ref.dtype, jnp.floating):
        pred = labels.astype(jnp.float32)[None, :, :] == cls.astype(jnp.float32)
    else:
        pred = labels.astype(jnp.int32)[None, :, :] == cls      # (C, tr, 128)

    if need_mask:
        # Mask padded lanes / rows of tail blocks and fully-out-of-range
        # (clamped duplicate) blocks.  Fold the predicate into the one-hot.
        start_row = (p * chunks_per_p + c) * tr        # intended first row
        row = jax.lax.broadcasted_iota(jnp.int32, (tr, 128), 0)
        lane = jax.lax.broadcasted_iota(jnp.int32, (tr, 128), 1)
        valid = ((start_row + row) * 128 + lane) < hw  # (tr, 128)
        x = jnp.where(valid[None, :, :], x, 0.0)
        pred = pred & valid[None, :, :]

    # Row-axis (sublane) partial reductions; lane axis reduced in the epilogue.
    acc_ref[0] += jnp.sum(jnp.where(pred, x, 0.0), axis=1)       # intersect
    acc_ref[1] += jnp.sum(pred.astype(jnp.float32), axis=1)      # y_sum (onehot^2==onehot)
    acc_ref[2] += jnp.sum(x * x, axis=1)                         # z_sum


def dice_loss(inputs, target, n_classes, weight=None, softmax=False,
              _target_tile_bytes=_TARGET_SCORE_TILE_BYTES):
    """Pallas implementation of DiceLoss.forward.

    inputs: (N, C, H, W) float scores (probabilities, or logits if softmax=True)
    target: (N, 1, H, W) class labels (any integer or float dtype)
    """
    N, C, H, W = inputs.shape
    assert C == n_classes, "predict & target shape do not match"
    HW = H * W
    HW_pad = _round_up(HW, 128)
    R = HW_pad // 128

    # Free reshapes only; padding copy happens only if HW % 128 != 0.
    score = inputs.reshape(N, C, HW)
    labels = target.reshape(N, 1, HW)            # keep native dtype (no cast pass)
    if HW_pad != HW:
        score = jnp.pad(score, ((0, 0), (0, 0), (0, HW_pad - HW)))
        labels = jnp.pad(labels, ((0, 0), (0, 0), (0, HW_pad - HW)))
    score = score.reshape(N, C, R, 128)
    labels = labels.reshape(N, 1, R, 128)

    # ---- Tile sizing -------------------------------------------------------
    score_itemsize = jnp.dtype(inputs.dtype).itemsize
    cap_rows = max(8, _target_tile_bytes // (C * 128 * score_itemsize))
    cap_rows8 = max(8, (cap_rows // 8) * 8)

    # 2-way spatial split when the batch axis has no parallelism (v7x 2nd TC).
    P = 2 if (N == 1 and R >= 16) else 1

    if P == 1:
        tr = R if R <= cap_rows else cap_rows8           # full-dim block is always legal
    else:
        tr = min(cap_rows8, _round_up(pl.cdiv(R, P), 8))  # multiple of 8, <= R for R>=16

    row_blocks = pl.cdiv(R, tr)
    chunks_per_p = pl.cdiv(row_blocks, P)
    clamp_needed = (P * chunks_per_p) > row_blocks
    need_mask = (P * chunks_per_p * tr * 128) != HW

    def _blk(p, c):
        blk = p * chunks_per_p + c
        if clamp_needed:
            blk = jnp.minimum(blk, row_blocks - 1)   # duplicate blocks are fully masked
        return blk

    score_map = lambda n, p, c: (n, 0, _blk(p, c), 0)
    label_map = lambda n, p, c: (n, 0, _blk(p, c), 0)

    kernel = functools.partial(
        _dice_partial_kernel,
        n_classes=n_classes,
        apply_softmax=bool(softmax),
        hw=HW, tr=tr, chunks_per_p=chunks_per_p, need_mask=need_mask)

    acc = pl.pallas_call(
        kernel,
        out_shape=jax.ShapeDtypeStruct((N, P, 3, C, 128), jnp.float32),
        grid=(N, P, chunks_per_p),
        in_specs=[
            pl.BlockSpec((None, C, tr, 128), score_map),
            pl.BlockSpec((None, None, tr, 128), label_map),
        ],
        out_specs=pl.BlockSpec((None, None, 3, C, 128),
                               lambda n, p, c: (n, p, 0, 0, 0)),
        compiler_params=pltpu.CompilerParams(
            dimension_semantics=("parallel", "parallel", "arbitrary"),
            vmem_limit_bytes=32 * 1024 * 1024),
    )(score, labels)

    # Tiny O(C) epilogue: finish the lane reduction and combine into the loss.
    sums = jnp.sum(acc, axis=(0, 1, 4))          # (3, C)
    intersect = sums[0]
    y_sum = sums[1]
    z_sum = sums[2]

    if weight is None:
        weight = [1.0] * n_classes
    w = jnp.asarray(weight, dtype=jnp.float32)

    smooth = jnp.float32(1e-5)
    dice = 1.0 - (2.0 * intersect + smooth) / (z_sum + y_sum + smooth)
    return jnp.sum(dice * w) / jnp.float32(n_classes)


def _dice_loss_reference(inputs, target, n_classes, weight=None, softmax=False):
    """Pure-JAX reference mirroring the PyTorch module (f32 math)."""
    inputs = inputs.astype(jnp.float32)
    if softmax:
        inputs = jax.nn.softmax(inputs, axis=1)
    tgt = target.astype(jnp.float32)                 # (N, 1, H, W)
    onehot = jnp.concatenate(
        [(tgt == float(i)).astype(jnp.float32) for i in range(n_classes)], axis=1)
    if weight is None:
        weight = [1.0] * n_classes
    smooth = 1e-5
    loss = 0.0
    for i in range(n_classes):
        s = inputs[:, i]
        t = onehot[:, i]
        intersect = jnp.sum(s * t)
        y_sum = jnp.sum(t * t)
        z_sum = jnp.sum(s * s)
        dice = 1.0 - (2 * intersect + smooth) / (z_sum + y_sum + smooth)
        loss = loss + dice * weight[i]
    return loss / n_classes


if __name__ == "__main__":
    key = jax.random.PRNGKey(0)
    k1, k2, k3, k4, k5, k6 = jax.random.split(key, 6)

    def check(loss_k, loss_r, tag):
        assert jnp.allclose(loss_k, loss_r, rtol=1e-5, atol=1e-6), (
            tag, float(loss_k), float(loss_r))

    # Case 1 / 2: N=2, C=4, 16x16 — softmax path and explicit-weight path.
    N, C, H, W = 2, 4, 16, 16
    logits = jax.random.normal(k1, (N, C, H, W), dtype=jnp.float32)
    target = jax.random.randint(k2, (N, 1, H, W), 0, C, dtype=jnp.int32)

    out = jax.block_until_ready(dice_loss(logits, target, C, softmax=True))
    check(out, _dice_loss_reference(logits, target, C, softmax=True), "case1")

    probs = jax.nn.softmax(logits, axis=1)
    wts = [0.5, 1.0, 2.0, 1.5]
    out = jax.block_until_ready(
        dice_loss(probs, target, C, weight=wts, softmax=False))
    check(out, _dice_loss_reference(probs, target, C, weight=wts, softmax=False),
          "case2")

    # Case 3: N=1 — exercises the 2-way spatial split (v7x second TensorCore).
    N, C, H, W = 1, 4, 64, 64
    logits = jax.random.normal(k3, (N, C, H, W), dtype=jnp.float32)
    target = jax.random.randint(k4, (N, 1, H, W), 0, C, dtype=jnp.int32)
    out = jax.block_until_ready(dice_loss(logits, target, C, softmax=True))
    check(out, _dice_loss_reference(logits, target, C, softmax=True), "case3")

    # Case 4: bf16 scores, float labels, HW not a multiple of 128 (pad + mask).
    N, C, H, W = 2, 3, 10, 12
    logits = jax.random.normal(k5, (N, C, H, W), dtype=jnp.float32).astype(jnp.bfloat16)
    target = jax.random.randint(k6, (N, 1, H, W), 0, C).astype(jnp.float32)
    out = jax.block_until_ready(dice_loss(logits, target, C, softmax=True))
    check(out, _dice_loss_reference(logits, target, C, softmax=True), "case4")

    # Case 5: tiny forced tile budget -> multi-chunk streaming + clamped
    # duplicate blocks on the split spatial axis (N=1, R=40 rows).
    N, C, H, W = 1, 4, 64, 80
    logits = jax.random.normal(k1, (N, C, H, W), dtype=jnp.float32)
    target = jax.random.randint(k2, (N, 1, H, W), 0, C, dtype=jnp.int32)
    out = jax.block_until_ready(
        dice_loss(logits, target, C, softmax=True, _target_tile_bytes=16 * 1024))
    check(out, _dice_loss_reference(logits, target, C, softmax=True), "case5")

    print("KERNEL_OK")
</pallas_src>

<mosaic_0001>
module attributes {stable_mosaic.version = 11 : i64} {
  func.func @_dice_partial_kernel(%arg0: i32, %arg1: i32, %arg2: i32, %arg3: memref<1x4x2x128xf32, #tpu.memory_space<vmem>>, %arg4: memref<1x1x2x128xi32, #tpu.memory_space<vmem>>, %arg5: memref<1x1x3x4x128xf32, #tpu.memory_space<vmem>>) attributes {dimension_semantics = [#tpu.dimension_semantics<parallel>, #tpu.dimension_semantics<parallel>, #tpu.dimension_semantics<arbitrary>], iteration_bounds = array<i64: 2, 1, 1>, scalar_prefetch = 0 : i64, scratch_operands = 0 : i64, tpu.core_type = #tpu.core_type<tc>, window_params = [{transform_indices = @transform_0, window_bounds = array<i64: 1, 4, 2, 128>}, {transform_indices = @transform_1, window_bounds = array<i64: 1, 1, 2, 128>}, {transform_indices = @transform_2, window_bounds = array<i64: 1, 1, 3, 4, 128>}]} {
    %c0_i32 = arith.constant 0 : i32
    %0 = arith.cmpi eq, %arg2, %c0_i32 : i32
    %1 = arith.extui %0 : i1 to i32
    %c0_i32_0 = arith.constant 0 : i32
    %2 = arith.cmpi ne, %1, %c0_i32_0 : i32
    scf.if %2 {
      %cst_41 = arith.constant 0.000000e+00 : f32
      %46 = vector.broadcast %cst_41 : f32 to vector<3x4x128xf32>
      %c0_42 = arith.constant 0 : index
      %c0_43 = arith.constant 0 : index
      %c0_44 = arith.constant 0 : index
      %c0_45 = arith.constant 0 : index
      %c0_46 = arith.constant 0 : index
      %47 = vector.load %arg5[%c0_42, %c0_43, %c0_44, %c0_45, %c0_46] : memref<1x1x3x4x128xf32, #tpu.memory_space<vmem>>, vector<1x1x3x4x128xf32>
      %48 = vector.shape_cast %47 : vector<1x1x3x4x128xf32> to vector<3x4x128xf32>
      %49 = vector.shape_cast %46 : vector<3x4x128xf32> to vector<1x1x3x4x128xf32>
      tpu.vector_store %arg5[%c0_42, %c0_43, %c0_44, %c0_45, %c0_46], %49 {strides = array<i32>} : memref<1x1x3x4x128xf32, #tpu.memory_space<vmem>>, vector<1x1x3x4x128xf32>,
    } else {
    }
    %c0 = arith.constant 0 : index
    %c0_1 = arith.constant 0 : index
    %c0_2 = arith.constant 0 : index
    %c0_3 = arith.constant 0 : index
    %3 = vector.load %arg3[%c0, %c0_1, %c0_2, %c0_3] : memref<1x4x2x128xf32, #tpu.memory_space<vmem>>, vector<1x4x2x128xf32>
    %4 = vector.shape_cast %3 : vector<1x4x2x128xf32> to vector<4x2x128xf32>
    %c0_4 = arith.constant 0 : index
    %c0_5 = arith.constant 0 : index
    %c0_6 = arith.constant 0 : index
    %c0_7 = arith.constant 0 : index
    %5 = vector.load %arg4[%c0_4, %c0_5, %c0_6, %c0_7] : memref<1x1x2x128xi32, #tpu.memory_space<vmem>>, vector<1x1x2x128xi32>
    %6 = vector.shape_cast %5 : vector<1x1x2x128xi32> to vector<2x128xi32>
    %cst = arith.constant dense<0xFF800000> : vector<2x128xf32>
    %7 = vector.multi_reduction <maximumf>, %4, %cst [0] : vector<4x2x128xf32> to vector<2x128xf32>
    %8 = vector.shape_cast %7 : vector<2x128xf32> to vector<1x2x128xf32>
    %9 = vector.broadcast %8 : vector<1x2x128xf32> to vector<4x2x128xf32>
    %10 = arith.subf %4, %9 : vector<4x2x128xf32>
    %11 = math.exp %10 : vector<4x2x128xf32>
    %cst_8 = arith.constant dense<0.000000e+00> : vector<2x128xf32>
    %12 = vector.multi_reduction <add>, %11, %cst_8 [0] : vector<4x2x128xf32> to vector<2x128xf32>
    %13 = vector.shape_cast %12 : vector<2x128xf32> to vector<1x2x128xf32>
    %14 = vector.broadcast %13 : vector<1x2x128xf32> to vector<4x2x128xf32>
    %15 = arith.divf %11, %14 : vector<4x2x128xf32>
    %16 = tpu.iota {dimensions = array<i32: 0>} : vector<4x2x128xi32>
    %17 = vector.shape_cast %6 : vector<2x128xi32> to vector<1x2x128xi32>
    %18 = vector.broadcast %17 : vector<1x2x128xi32> to vector<4x2x128xi32>
    %19 = arith.cmpi eq, %18, %16 : vector<4x2x128xi32>
    %c0_9 = arith.constant 0 : index
    %c0_10 = arith.constant 0 : index
    %c0_11 = arith.constant 0 : index
    %c0_12 = arith.constant 0 : index
    %c0_13 = arith.constant 0 : index
    %20 = vector.load %arg5[%c0_9, %c0_10, %c0_11, %c0_12, %c0_13] : memref<1x1x3x4x128xf32, #tpu.memory_space<vmem>>, vector<1x1x1x4x128xf32>
    %21 = vector.shape_cast %20 : vector<1x1x1x4x128xf32> to vector<4x128xf32>
    %cst_14 = arith.constant 0.000000e+00 : f32
    %22 = vector.broadcast %cst_14 : f32 to vector<4x2x128xf32>
    %23 = arith.select %19, %15, %22 : vector<4x2x128xi1>, vector<4x2x128xf32>
    %cst_15 = arith.constant dense<0.000000e+00> : vector<4x128xf32>
    %24 = vector.multi_reduction <add>, %23, %cst_15 [1] : vector<4x2x128xf32> to vector<4x128xf32>
    %25 = arith.addf %21, %24 : vector<4x128xf32>
    %c0_16 = arith.constant 0 : index
    %c0_17 = arith.constant 0 : index
    %c0_18 = arith.constant 0 : index
    %c0_19 = arith.constant 0 : index
    %c0_20 = arith.constant 0 : index
    %26 = vector.load %arg5[%c0_16, %c0_17, %c0_18, %c0_19, %c0_20] : memref<1x1x3x4x128xf32, #tpu.memory_space<vmem>>, vector<1x1x1x4x128xf32>
    %27 = vector.shape_cast %26 : vector<1x1x1x4x128xf32> to vector<4x128xf32>
    %28 = vector.shape_cast %25 : vector<4x128xf32> to vector<1x1x1x4x128xf32>
    tpu.vector_store %arg5[%c0_16, %c0_17, %c0_18, %c0_19, %c0_20], %28 {strides = array<i32>} : memref<1x1x3x4x128xf32, #tpu.memory_space<vmem>>, vector<1x1x1x4x128xf32>,
    %c0_21 = arith.constant 0 : index
    %c0_22 = arith.constant 0 : index
    %c1 = arith.constant 1 : index
    %c0_23 = arith.constant 0 : index
    %c0_24 = arith.constant 0 : index
    %29 = vector.load %arg5[%c0_21, %c0_22, %c1, %c0_23, %c0_24] : memref<1x1x3x4x128xf32, #tpu.memory_space<vmem>>, vector<1x1x1x4x128xf32>
    %30 = vector.shape_cast %29 : vector<1x1x1x4x128xf32> to vector<4x128xf32>
    %31 = arith.extui %19 : vector<4x2x128xi1> to vector<4x2x128xi32>
    %32 = arith.sitofp %31 : vector<4x2x128xi32> to vector<4x2x128xf32>
    %cst_25 = arith.constant dense<0.000000e+00> : vector<4x128xf32>
    %33 = vector.multi_reduction <add>, %32, %cst_25 [1] : vector<4x2x128xf32> to vector<4x128xf32>
    %34 = arith.addf %30, %33 : vector<4x128xf32>
    %c0_26 = arith.constant 0 : index
    %c0_27 = arith.constant 0 : index
    %c1_28 = arith.constant 1 : index
    %c0_29 = arith.constant 0 : index
    %c0_30 = arith.constant 0 : index
    %35 = vector.load %arg5[%c0_26, %c0_27, %c1_28, %c0_29, %c0_30] : memref<1x1x3x4x128xf32, #tpu.memory_space<vmem>>, vector<1x1x1x4x128xf32>
    %36 = vector.shape_cast %35 : vector<1x1x1x4x128xf32> to vector<4x128xf32>
    %37 = vector.shape_cast %34 : vector<4x128xf32> to vector<1x1x1x4x128xf32>
    tpu.vector_store %arg5[%c0_26, %c0_27, %c1_28, %c0_29, %c0_30], %37 {strides = array<i32>} : memref<1x1x3x4x128xf32, #tpu.memory_space<vmem>>, vector<1x1x1x4x128xf32>,
    %c0_31 = arith.constant 0 : index
    %c0_32 = arith.constant 0 : index
    %c2 = arith.constant 2 : index
    %c0_33 = arith.constant 0 : index
    %c0_34 = arith.constant 0 : index
    %38 = vector.load %arg5[%c0_31, %c0_32, %c2, %c0_33, %c0_34] : memref<1x1x3x4x128xf32, #tpu.memory_space<vmem>>, vector<1x1x1x4x128xf32>
    %39 = vector.shape_cast %38 : vector<1x1x1x4x128xf32> to vector<4x128xf32>
    %40 = arith.mulf %15, %15 : vector<4x2x128xf32>
    %cst_35 = arith.constant dense<0.000000e+00> : vector<4x128xf32>
    %41 = vector.multi_reduction <add>, %40, %cst_35 [1] : vector<4x2x128xf32> to vector<4x128xf32>
    %42 = arith.addf %39, %41 : vector<4x128xf32>
    %c0_36 = arith.constant 0 : index
    %c0_37 = arith.constant 0 : index
    %c2_38 = arith.constant 2 : index
    %c0_39 = arith.constant 0 : index
    %c0_40 = arith.constant 0 : index
    %43 = vector.load %arg5[%c0_36, %c0_37, %c2_38, %c0_39, %c0_40] : memref<1x1x3x4x128xf32, #tpu.memory_space<vmem>>, vector<1x1x1x4x128xf32>
    %44 = vector.shape_cast %43 : vector<1x1x1x4x128xf32> to vector<4x128xf32>
    %45 = vector.shape_cast %42 : vector<4x128xf32> to vector<1x1x1x4x128xf32>
    tpu.vector_store %arg5[%c0_36, %c0_37, %c2_38, %c0_39, %c0_40], %45 {strides = array<i32>} : memref<1x1x3x4x128xf32, #tpu.memory_space<vmem>>, vector<1x1x1x4x128xf32>,
    return
  }
  func.func @transform_0(%arg0: i32, %arg1: i32, %arg2: i32) -> (i32, i32, i32, i32) {
    %c1_i32 = arith.constant 1 : i32
    %0 = arith.muli %arg1, %c1_i32 : i32
    %1 = arith.addi %0, %arg2 : i32
    %c0_i32 = arith.constant 0 : i32
    %c0_i32_0 = arith.constant 0 : i32
    %c0_i32_1 = arith.constant 0 : i32
    return %arg0, %c0_i32, %1, %c0_i32_0 : i32, i32, i32, i32
  }
  func.func @transform_1(%arg0: i32, %arg1: i32, %arg2: i32) -> (i32, i32, i32, i32) {
    %c1_i32 = arith.constant 1 : i32
    %0 = arith.muli %arg1, %c1_i32 : i32
    %1 = arith.addi %0, %arg2 : i32
    %c0_i32 = arith.constant 0 : i32
    %c0_i32_0 = arith.constant 0 : i32
    %c0_i32_1 = arith.constant 0 : i32
    return %arg0, %c0_i32, %1, %c0_i32_0 : i32, i32, i32, i32
  }
  func.func @transform_2(%arg0: i32, %arg1: i32, %arg2: i32) -> (i32, i32, i32, i32, i32) {
    %c0_i32 = arith.constant 0 : i32
    %c0_i32_0 = arith.constant 0 : i32
    %c0_i32_1 = arith.constant 0 : i32
    %c0_i32_2 = arith.constant 0 : i32
    return %arg0, %arg1, %c0_i32, %c0_i32_0, %c0_i32_1 : i32, i32, i32, i32, i32
  }
}

</mosaic_0001>

<bundles_post_ra>
// kernel: tpu_custom_call.1
= control target key start
LH: loop header
LB: loop body
LE: loop exit
PB: predicated region body
PF: predicated region fallthrough
CT: control target
= control target key end

     0   :  { %7 = vsyncpa [#allocation3], 0  ;;  %s1064_s0 = inlined_call_operand.hbm [shape: f32[2,4,2,128], index: 0, kind: input, shape index: {}]   ;;  %s1065_s1 = inlined_call_operand.hbm [shape: s32[2,1,2,128], index: 1, kind: input, shape index: {}]   ;;  %s1066_s2 = inlined_call_operand.hbm [shape: f32[2,1,3,4,128], index: 2, kind: output, shape index: {}]  }
   0x1   :  { %9 = vsyncpa [#allocation3 + $0x1], 0 }
   0x2   :  { %10 = vsyncpa [#allocation6], 0 }
   0x3   :  { %12 = vsyncpa [#allocation6 + $0x1], 0 }
   0x4   :  { %13 = vsyncpa [#allocation4], 0 }
   0x5   :  { %15 = vsyncpa [#allocation4 + $0x1], 0  ;;  %s824_s9 = smov 0   ;;  %s826_s10 = smov 0  }
   0x6   :  { %s828_s11 = smov 0   ;;  %s830_s12 = smov 0  }
   0x7   :  { %s832_s13 = smov 0   ;;  %s834_s14 = smov 0  }
   0x8 LB: > { %s551_s15 = sadd.s32 4294967295, %s799_s14   ;;  %s552_s16 = sadd.s32 4294967294, %s799_s14   ;;  %s799_s14 = sphi %s834_s14, %s21_s14   ;;  %s795_s13 = sphi %s832_s13, %s1077_s13   ;;  %s791_s12 = sphi %s830_s12, %s1076_s12   ;;  %s787_s11 = sphi %s828_s11, %s1075_s11   ;;  %s783_s10 = sphi %s826_s10, %s1074_s10   ;;  %s779_s9 = sphi %s824_s9, %s1073_s9  }
   0x9   : > { %s40_s17 = sadd.s32 1, %s795_s13  ;;  %s51_s18 = sadd.s32 1, %s787_s11 }
   0xa   : > { %p42_p0 = scmp.ge.s32.totalorder %s40_s17, 2  ;;  %p58_p1 = scmp.ne.s32.totalorder %s787_s11, %s783_s10 }
   0xb   : > { %p59_p2 = scmp.eq.s32.totalorder %s799_s14, 0  ;;  %p64_p3 = scmp.ne.s32.totalorder %s783_s10, %s779_s9 }
   0xc   : > { %s1079_s17 = smov (%p42_p0, %s40_s17), 0  ;;  %p65_p5 = scmp.eq.s32.totalorder %s551_s15, 0 }
   0xd   : > { %p865_p4 = por %p59_p2, %p58_p1  ;;  %s46_s20 = ssub.s32 %s795_s13, %s1079_s17 }
   0xe   : > { %p120_p6 = scmp.eq.s32.totalorder %s551_s15, 1  ;;  %p49_p7 = scmp.eq.s32.totalorder %s46_s20, 0 }
   0xf   : > { %p871_p8 = por %p65_p5, %p64_p3  ;;  %p126_p10 = scmp.eq.s32.totalorder %s552_s16, 1 }
  0x10   : > { %p875_p9 = por %p120_p6, %p58_p1  ;;  %p554_p12 = scmp.ge.s32.totalorder %s799_s14, 2 }
  0x11   : > { %s880_s23 = scalar_select %p49_p7, %s787_s11, %s51_s18  }
  0x12   : > { %p882_p11 = por %p126_p10, %p64_p3  ;;  %p594_p13 = scmp.lt.s32.totalorder %s799_s14, 2 }
  0x13   : > { %s889_s25 = sand.u32 1, %s787_s11   ;;  %s574_s27 = sshll.u32 %s795_s13, 7 }
  0x14   : > { %s555_s26 = sshll.u32 %s889_s25, 3  ;;  %s158_s30 = scalar_lea.hbm %s1064_s0, %s574_s27 }
  0x15   : > { %s150_s3 = scalar_lea.vmem [#allocation2], %s555_s26  ;;  %p898_p0 = pnand %p594_p13, %p865_p4 }
  0x16   : > { %s159_s4 = sshll.u32 %s150_s3, 4  ;;  %p560_p1 = scmp.ge.s32.totalorder %s799_s14, 1  ;;  %s160_s4 = int_to_ptr.vmem [resolvable:$true] %s159_s4 }
  0x17   : > { %s147_s6 = scalar_lea.sflag [#allocation3], %s889_s25  ;;  %p661_p2 = pneg %p898_p0 }
  0x18   : > { %s672_s7 = scalar_lea.vmem %s160_s4, 128  ;;  %s801_s8 = smov [#allocation2]  }
  0x19   : > { %p673_p3 = scmp.ne.s32.totalorder %s160_s4, %s672_s7  ;;  %s677_s15 = sshll.u32 %s801_s8, 4  ;;  %s678_s15 = int_to_ptr.vmem [resolvable:$false] %s677_s15 }
  0x1a   : > { %s679_s16 = scalar_lea.vmem %s678_s15, 256  ;;  %p680_p4 = scmp.lt.s32.totalorder %s160_s4, %s678_s15 }
  0x1b   : > { %p675_p5 = pnand %p673_p3, %p661_p2  ;;  %p681_p7 = scmp.lt.s32.totalorder %s679_s16, %s672_s7 }
  0x1d   : > { %p676_p6 = pneg %p675_p5  ;;  %p682_p10 = por %p681_p7, %p680_p4 }
  0x1f   : > { %p683_p13 = pnand %p682_p10, %p676_p6 }
  0x21   : > { %686 = shalt.err (!%p683_p13)
}
  0x22   : > { %s802_s18 = smov 32   ;;  %s803_s19 = smov 2  }
  0x23   : > { %586 = dma.hbm_to_vmem [thread:$0]  (!%p898_p0), %s158_s30, 128, %s160_s4, %s147_s6, %s802_s18, %s802_s18, %s803_s19  }
  0x24   : > { %p187_p3 = scmp.lt.s32.totalorder %s799_s14, 3  ;;  %s558_s20 = sshll.u32 %s889_s25, 1 }
  0x25   : > { %s559_s26 = sshll.u32 %s795_s13, 5  ;;  %s173_s7 = scalar_lea.vmem [#allocation5], %s558_s20 }
  0x26   : > { %p916_p5 = pnand %p560_p1, %p187_p3  ;;  %s180_s3 = scalar_lea.hbm %s1065_s1, %s559_s26 }
  0x27   : > { %s182_s8 = sshll.u32 %s173_s7, 4  ;;  %s170_s15 = scalar_lea.sflag [#allocation6], %s889_s25  ;;  %s183_s8 = int_to_ptr.vmem [resolvable:$true] %s182_s8 }
  0x28   : > { %s700_s16 = scalar_lea.vmem %s183_s8, 32  ;;  %s804_s30 = smov [#allocation5]  }
  0x29   : > { %p701_p6 = scmp.ne.s32.totalorder %s183_s8, %s700_s16  ;;  %s705_s4 = sshll.u32 %s804_s30, 4  ;;  %s706_s4 = int_to_ptr.vmem [resolvable:$false] %s705_s4 }
  0x2a   : > { %s707_s6 = scalar_lea.vmem %s706_s4, 64  ;;  %p708_p1 = scmp.lt.s32.totalorder %s183_s8, %s706_s4 }
  0x2b   : > { %p703_p4 = pnand %p701_p6, %p661_p2  ;;  %p709_p10 = scmp.lt.s32.totalorder %s707_s6, %s700_s16 }
  0x2d   : > { %p704_p7 = pneg %p703_p4  ;;  %p710_p13 = por %p709_p10, %p708_p1 }
  0x2f   : > { %p711_p3 = pnand %p710_p13, %p704_p7 }
  0x31   : > { %714 = shalt.err (!%p711_p3)
}
  0x32   : > { %589 = dma.hbm_to_vmem [thread:$0]  (!%p898_p0), %s180_s3, 32, %s183_s8, %s170_s15  }
  0x33   : > { %191 = sbr.rel (%p916_p5) target bundleno = 148 (0x94), region = 28  ;;  %s932_s25 = sand.u32 (!%p916_p5), 1, %s783_s10  }
  0x34   : > { %s561_s18 = sshll.u32 (!%p916_p5), %s932_s25, 3  ;;  %s194_s19 = scalar_lea.sflag (!%p916_p5), [#allocation3], %s932_s25 }
  0x35   : > { %s197_s20 = scalar_lea.vmem (!%p916_p5), [#allocation2], %s561_s18 }
  0x38   : > { %766 = dma.done.wait (%p871_p8), %s194_s19, 128  }
  0x39   : > { %768 = vsyncadd (%p871_p8), %s194_s19, 4294967168  ;;  %s562_s5 = sshll.u32 %s932_s25, 1  ;;  %s203_s26 = scalar_lea.sflag [#allocation6], %s932_s25 }
  0x3a   : > { %s206_s27 = scalar_lea.vmem [#allocation5], %s562_s5 }
  0x3b   : > { %770 = dma.done.wait (%p871_p8), %s203_s26, 32  }
  0x3c   : > { %772 = vsyncadd (%p871_p8), %s203_s26, 4294967264  ;;  %s575_s28 = smul.u32 12, %s932_s25  ;;  %v805_v0 = vmov 0.0   ;;  %vm246_vm0 = vcmask 1041408   ;;  %v241_v1 = vld [vmem:[%s197_s20] sm:$0x3] }
  0x3d   : > { %v242_v2 = vld [vmem:[%s197_s20 + $0x2] sm:$0x3]  ;;  %v243_v3 = vld [vmem:[%s197_s20 + $0x4] sm:$0x3]  ;;  %v244_v4 = vld [vmem:[%s197_s20 + $0x6] sm:$0x3] }
  0x3e   : > { %s947_s29 = scalar_lea.vmem [#allocation7], %s575_s28  ;;  %v952_v5 = vld [vmem:[%s206_s27] sm:$0x3]  ;;  %v247_v6 = vsel %vm246_vm0, %v241_v1, -inf  ;;  %v248_v7 = vsel %vm246_vm0, %v242_v2, -inf  ;;  %v249_v8 = vsel %vm246_vm0, %v243_v3, -inf }
  0x3f   : > { %238 = vst [vmem:[%s947_s29] sm:$0xf] %v805_v0  ;;  %239 = vst [vmem:[%s947_s29 + $0x4] sm:$0xf] %v805_v0  ;;  %v250_v9 = vsel %vm246_vm0, %v244_v4, -inf  ;;  %v251_v10 = vmax.f32 %v247_v6, %v248_v7  ;;  %vm278_vm1 = vcmp.eq.s32.totalorder %v952_v5, 0  ;;  %vm279_vm2 = vcmp.eq.s32.totalorder %v952_v5, 1 }
  0x40   : > { %240 = vst [vmem:[%s947_s29 + $0x8] sm:$0xf] %v805_v0  ;;  %v252_v11 = vmax.f32 %v249_v8, %v250_v9  ;;  %vm280_vm3 = vcmp.eq.s32.totalorder %v952_v5, 2  ;;  %vm281_vm4 = vcmp.eq.s32.totalorder %v952_v5, 3  ;;  %v564_v12 = vsel %vm278_vm1, 1.0, %v805_v0  ;;  %s576_s21 = smul.u32 192, %s791_s12 }
  0x41   : > { %v565_v13 = vsel %vm279_vm2, 1.0, %v805_v0  ;;  %v566_v14 = vsel %vm280_vm3, 1.0, %v805_v0  ;;  %v567_v15 = vsel %vm281_vm4, 1.0, %v805_v0  ;;  %v338_v17 = vsel %vm246_vm0, %v564_v12, 0.0  ;;  %s436_s3 = sshll.u32 %s947_s29, 4  ;;  %s421_s12 = scalar_lea.sflag [#allocation4], %s932_s25  ;;  %s1015_s3 = int_to_ptr.vmem [resolvable:$true] %s436_s3 }
  0x42   : > { %v253_v16 = vmax.f32 %v251_v10, %v252_v11  ;;  %v345_v18 = vsel %vm246_vm0, %v565_v13, 0.0  ;;  %v352_v19 = vsel %vm246_vm0, %v566_v14, 0.0  ;;  %v339_v20 = vrot.slane %v338_v17, 4  ;;  %s1013_s15 = scalar_lea.hbm %s1066_s2, %s576_s21  ;;  %s715_s16 = scalar_lea.vmem %s1015_s3, 192 }
  0x43   : > { %v346_v21 = vrot.slane %v345_v18, 4  ;;  %v353_v22 = vrot.slane %v352_v19, 4  ;;  %v359_v23 = vsel %vm246_vm0, %v567_v15, 0.0  ;;  %vm319_vm5 = vcmask 1041409   ;;  %p716_p8 = scmp.ne.s32.totalorder %s1015_s3, %s715_s16  ;;  %s806_s30 = smov [#allocation7]  }
  0x44   : > { %v254_v24 = vsub.f32 %v241_v1, %v253_v16  ;;  %v255_v25 = vsub.f32 %v242_v2, %v253_v16  ;;  %v256_v26 = vsub.f32 %v243_v3, %v253_v16  ;;  %v257_v27 = vsub.f32 %v244_v4, %v253_v16  ;;  %s719_s4 = sshll.u32 %s806_s30, 4  ;;  %s720_s4 = int_to_ptr.vmem [resolvable:$false] %s719_s4 }
  0x45   : > { %v340_v28 = vadd.f32 %v339_v20, %v338_v17  ;;  %v347_v29 = vadd.f32 %v346_v21, %v345_v18  ;;  %v354_v30 = vadd.f32 %v353_v22, %v352_v19  ;;  %v360_v31 = vrot.slane %v359_v23, 4  ;;  %p717_p0 = pnand %p716_p8, %p875_p9  ;;  %s721_s6 = scalar_lea.vmem %s720_s4, 384 }
  0x46   : > { %v258_v32 = vmul.f32 1.442695, %v254_v24  ;;  %v260_v33 = vmul.f32 1.442695, %v255_v25  ;;  %v262_v34 = vmul.f32 1.442695, %v256_v26  ;;  %p722_p5 = scmp.lt.s32.totalorder %s1015_s3, %s720_s4  ;;  %p723_p6 = scmp.lt.s32.totalorder %s721_s6, %s715_s16 }
  0x47   : > { %v264_v35 = vmul.f32 1.442695, %v257_v27  ;;  %v341_v36 = vrot.slane %v340_v28, 2  ;;  %v348_v37 = vrot.slane %v347_v29, 2  ;;  %v355_v38 = vrot.slane %v354_v30, 2  ;;  %p718_p2 = pneg %p717_p0 }
  0x48   : > { %649 = vpow2.f32 %v258_v32  ;;  %v361_v39 = vadd.f32 %v360_v31, %v359_v23  ;;  %vm321_vm6 = vcmask 1042434   ;;  %vm323_vm7 = vcmask 1043459   ;;  %v563_v53 = vld [vmem:[%s947_s29 + $0x4] sm:$0xf]  ;;  %p724_p4 = por %p723_p6, %p722_p5 }
  0x49   : > { %651 = vpow2.f32 %v260_v33  ;;  %v342_v40 = vadd.f32 %v341_v36, %v340_v28  ;;  %v349_v41 = vadd.f32 %v348_v37, %v347_v29  ;;  %v356_v42 = vadd.f32 %v355_v38, %v354_v30 }
  0x4a   : > { %653 = vpow2.f32 %v262_v34  ;;  %v362_v43 = vrot.slane %v361_v39, 2  ;;  %p725_p7 = pnand %p724_p4, %p718_p2 }
  0x4b   : > { %655 = vpow2.f32 %v264_v35  ;;  %v343_v44 = vrot.slane %v342_v40, 1  ;;  %v350_v45 = vrot.slane %v349_v41, 1  ;;  %v357_v46 = vrot.slane %v356_v42, 1 }
  0x4c   : > { %v363_v47 = vadd.f32 %v362_v43, %v361_v39 }
  0x4d   : > { %v344_v48 = vadd.f32 %v343_v44, %v342_v40  ;;  %v351_v49 = vadd.f32 %v350_v45, %v349_v41  ;;  %v358_v50 = vadd.f32 %v357_v46, %v356_v42 }
  0x4e   : > { %v364_v51 = vrot.slane %v363_v47, 1 }
  0x4f   : > { %v370_v52 = vsel %vm319_vm5, %v351_v49, %v344_v48 }
  0x50   : > { %v365_v54 = vadd.f32 %v364_v51, %v363_v47  ;;  %v371_v55 = vsel %vm321_vm6, %v358_v50, %v370_v52 }
  0x52   : > { %v372_v56 = vsel %vm323_vm7, %v365_v54, %v371_v55 }
  0x53   : > { %v374_v57 = vadd.f32 %v563_v53, %v372_v56 }
  0x55   : > { %v650_v58 = vpop.eup %649  ;;  %568 = vst [vmem:[%s947_s29 + $0x4] sm:$0xf] %v374_v57 }
  0x56   : > { %v652_v59 = vpop.eup %651  ;;  %v266_v60 = vsel %vm246_vm0, %v650_v58, 0.0 }
  0x57   : > { %v654_v61 = vpop.eup %653  ;;  %v267_v62 = vsel %vm246_vm0, %v652_v59, 0.0 }
  0x58   : > { %v656_v63 = vpop.eup %655  ;;  %v268_v0 = vadd.f32 %v267_v62, %v266_v60  ;;  %v269_v1 = vsel %vm246_vm0, %v654_v61, 0.0 }
  0x59   : > { %v271_v2 = vsel %vm246_vm0, %v656_v63, 0.0 }
  0x5a   : > { %v270_v3 = vadd.f32 %v269_v1, %v268_v0 }
  0x5c   : > { %v272_v4 = vadd.f32 %v271_v2, %v270_v3  ;;  %v282_v2 = vld [vmem:[%s947_s29] sm:$0xf] }
  0x5e   : > { %657 = vrcp.f32 %v272_v4 }
  0x6b   : > { %v658_v6 = vpop.eup %657 }
  0x6c   : > { %v274_v7 = vmul.f32 %v658_v6, %v650_v58  ;;  %v275_v8 = vmul.f32 %v658_v6, %v652_v59  ;;  %v276_v9 = vmul.f32 %v658_v6, %v654_v61  ;;  %v277_v10 = vmul.f32 %v658_v6, %v656_v63 }
  0x6e   : > { %v283_v11 = vsel %vm278_vm1, %v274_v7, 0.0  ;;  %v284_v12 = vsel %vm279_vm2, %v275_v8, 0.0  ;;  %v285_v13 = vsel %vm280_vm3, %v276_v9, 0.0  ;;  %v286_v14 = vsel %vm281_vm4, %v277_v10, 0.0 }
  0x6f   : > { %v287_v15 = vsel %vm246_vm0, %v283_v11, 0.0  ;;  %v294_v16 = vsel %vm246_vm0, %v284_v12, 0.0  ;;  %v301_v17 = vsel %vm246_vm0, %v285_v13, 0.0  ;;  %v308_v18 = vsel %vm246_vm0, %v286_v14, 0.0 }
  0x70   : > { %v288_v19 = vrot.slane %v287_v15, 4  ;;  %v295_v20 = vrot.slane %v294_v16, 4  ;;  %v302_v21 = vrot.slane %v301_v17, 4  ;;  %v309_v22 = vrot.slane %v308_v18, 4 }
  0x71   : > { %v378_v23 = vmul.f32 %v274_v7, %v274_v7  ;;  %v379_v24 = vmul.f32 %v275_v8, %v275_v8  ;;  %v380_v25 = vmul.f32 %v276_v9, %v276_v9  ;;  %v381_v26 = vmul.f32 %v277_v10, %v277_v10 }
  0x72   : > { %v289_v27 = vadd.f32 %v288_v19, %v287_v15  ;;  %v296_v28 = vadd.f32 %v295_v20, %v294_v16  ;;  %v303_v5 = vadd.f32 %v302_v21, %v301_v17  ;;  %v310_v29 = vadd.f32 %v309_v22, %v308_v18  ;;  %v569_v16 = vld [vmem:[%s947_s29 + $0x8] sm:$0xf] }
  0x73   : > { %v382_v30 = vsel %vm246_vm0, %v378_v23, 0.0  ;;  %v389_v31 = vsel %vm246_vm0, %v379_v24, 0.0  ;;  %v396_v32 = vsel %vm246_vm0, %v380_v25, 0.0  ;;  %v403_v33 = vsel %vm246_vm0, %v381_v26, 0.0 }
  0x74   : > { %v290_v34 = vrot.slane %v289_v27, 2  ;;  %v297_v35 = vrot.slane %v296_v28, 2  ;;  %v304_v36 = vrot.slane %v303_v5, 2  ;;  %v311_v37 = vrot.slane %v310_v29, 2 }
  0x75   : > { %v383_v38 = vrot.slane %v382_v30, 4  ;;  %v390_v39 = vrot.slane %v389_v31, 4  ;;  %v397_v40 = vrot.slane %v396_v32, 4  ;;  %v404_v41 = vrot.slane %v403_v33, 4 }
  0x76   : > { %v291_v42 = vadd.f32 %v290_v34, %v289_v27  ;;  %v298_v43 = vadd.f32 %v297_v35, %v296_v28  ;;  %v305_v44 = vadd.f32 %v304_v36, %v303_v5  ;;  %v312_v45 = vadd.f32 %v311_v37, %v310_v29 }
  0x77   : > { %v384_v46 = vadd.f32 %v383_v38, %v382_v30  ;;  %v391_v47 = vadd.f32 %v390_v39, %v389_v31  ;;  %v398_v48 = vadd.f32 %v397_v40, %v396_v32  ;;  %v405_v49 = vadd.f32 %v404_v41, %v403_v33 }
  0x78   : > { %v292_v50 = vrot.slane %v291_v42, 1  ;;  %v299_v51 = vrot.slane %v298_v43, 1  ;;  %v306_v52 = vrot.slane %v305_v44, 1  ;;  %v313_v53 = vrot.slane %v312_v45, 1 }
  0x79   : > { %v385_v54 = vrot.slane %v384_v46, 2  ;;  %v392_v55 = vrot.slane %v391_v47, 2  ;;  %v399_v56 = vrot.slane %v398_v48, 2  ;;  %v406_v57 = vrot.slane %v405_v49, 2 }
  0x7a   : > { %v293_v58 = vadd.f32 %v292_v50, %v291_v42  ;;  %v300_v59 = vadd.f32 %v299_v51, %v298_v43  ;;  %v307_v60 = vadd.f32 %v306_v52, %v305_v44  ;;  %v314_v61 = vadd.f32 %v313_v53, %v312_v45 }
  0x7b   : > { %v386_v62 = vadd.f32 %v385_v54, %v384_v46  ;;  %v393_v63 = vadd.f32 %v392_v55, %v391_v47  ;;  %v400_v0 = vadd.f32 %v399_v56, %v398_v48  ;;  %v407_v1 = vadd.f32 %v406_v57, %v405_v49 }
  0x7c   : > { %v320_v3 = vsel %vm319_vm5, %v300_v59, %v293_v58 }
  0x7d   : > { %v322_v4 = vsel %vm321_vm6, %v307_v60, %v320_v3  ;;  %v387_v6 = vrot.slane %v386_v62, 1  ;;  %v394_v7 = vrot.slane %v393_v63, 1  ;;  %v401_v8 = vrot.slane %v400_v0, 1 }
  0x7e   : > { %v324_v9 = vsel %vm323_vm7, %v314_v61, %v322_v4  ;;  %v408_v10 = vrot.slane %v407_v1, 1 }
  0x7f   : > { %v326_v11 = vadd.f32 %v324_v9, %v282_v2  ;;  %v388_v12 = vadd.f32 %v387_v6, %v386_v62  ;;  %v395_v13 = vadd.f32 %v394_v7, %v393_v63  ;;  %v402_v14 = vadd.f32 %v401_v8, %v400_v0 }
  0x80   : > { %v409_v15 = vadd.f32 %v408_v10, %v407_v1 }
  0x81   : > { %327 = vst [vmem:[%s947_s29] sm:$0xf] %v326_v11  ;;  %v414_v17 = vsel %vm319_vm5, %v395_v13, %v388_v12 }
  0x82   : > { %v415_v18 = vsel %vm321_vm6, %v402_v14, %v414_v17 }
  0x83   : > { %v416_v19 = vsel %vm323_vm7, %v409_v15, %v415_v18 }
  0x84   : > { %v418_v20 = vadd.f32 %v569_v16, %v416_v19 }
  0x86   : > { %570 = vst [vmem:[%s947_s29 + $0x8] sm:$0xf] %v418_v20 }
  0x87   : > { %728 = shalt.err (!%p725_p7)
}
  0x88   : > { %s729_s18 = scalar_lea.hbm %s1013_s15, 192  ;;  %s733_s5 = scalar_lea.hbm %s1066_s2, 384 }
  0x89   : > { %p730_p1 = scmp.ne.s32.totalorder %s1013_s15, %s729_s18  ;;  %p734_p3 = scmp.lt.s32.totalorder %s1013_s15, %s1066_s2 }
  0x8a   : > { %p735_p8 = scmp.lt.s32.totalorder %s733_s5, %s729_s18 }
  0x8b   : > { %p731_p10 = pnand %p730_p1, %p875_p9 }
  0x8c   : > { %p736_p0 = por %p735_p8, %p734_p3 }
  0x8d   : > { %p732_p13 = pneg %p731_p10 }
  0x8f   : > { %p737_p2 = pnand %p736_p0, %p732_p13 }
  0x91   : > { %740 = shalt.err (!%p737_p2)
}
  0x92   : > { %s807_s28 = smov 64   ;;  %s808_s29 = smov 4  }
  0x93   : > { %581 = dma.vmem_to_hbm [thread:$0]  (%p875_p9), %s1015_s3, 192, %s1013_s15, %s421_s12, %s807_s28, %s807_s28, %s808_s29  }
  0x94 PF: > { %s451_s21 = sand.u32 1, %s779_s9   ;;  %p591_p5 = pnand %p554_p12, %p882_p11 }
  0x95   : > { %s452_s7 = scalar_lea.sflag [#allocation4], %s451_s21 }
  0x96   : > { %p592_p6 = pneg %p591_p5 }
  0x98   : > { %774 = dma.done.wait (%p592_p6), %s452_s7, 192  }
  0x99   : > { %776 = vsyncadd (%p592_p6), %s452_s7, 4294967104  ;;  %s21_s14 = sadd.s32 1, %s799_s14   ;;  %s1073_s9 = smov %s783_s10 }
  0x9a   : > { %p18_p4 = scmp.ge.s32.totalorder %s21_s14, 4   ;;  %s1074_s10 = smov %s787_s11 }
  0x9b   : > { %s1075_s11 = smov %s880_s23  ;;  %s1076_s12 = smov %s795_s13 }
  0x9c   : > { %s1077_s13 = smov %s1079_s17  ;;  %20 = sbr.rel (!%p18_p4) target bundleno = 8 (0x8), region = 92 }
  0xa1   :  { %457 = vsyncpa [#allocation3], 1 }
  0xa2   :  { %459 = vsyncpa [#allocation3 + $0x1], 1 }
  0xa3   :  { %460 = vsyncpa [#allocation6], 1 }
  0xa4   :  { %462 = vsyncpa [#allocation6 + $0x1], 1 }
  0xa5   :  { %463 = vsyncpa [#allocation4], 1 }
  0xa6   :  { %465 = vsyncpa [#allocation4 + $0x1], 1 }

</bundles_post_ra>
